<compile_context>
chip_gen: v6e
topology: v6e:2x2x1
jax: 0.10.0
libtpu: 0.0.40
codegen_flags: <defaults>
</compile_context>

<pallas_src>
import functools

import jax
import jax.numpy as jnp
from jax import lax
from jax.experimental import pallas as pl
from jax.experimental.pallas import tpu as pltpu


# ---------------------------------------------------------------------------
# Chip-aware budgets
# ---------------------------------------------------------------------------

def _budgets():
    """Return (vmem_limit_bytes, streaming_block_budget, fused_slab_budget)."""
    vmem_phys = None
    try:
        info = pltpu.get_tpu_info()
        vmem_phys = getattr(info, "vmem_capacity_bytes", None)
    except Exception:
        vmem_phys = None
    if not vmem_phys:
        vmem_phys = 64 * 1024 * 1024          # conservative: assume v7x-sized VMEM
    if vmem_phys >= 128 * 1024 * 1024:        # v5e / v6e: 128 MiB physical VMEM
        vmem_limit = 64 * 1024 * 1024         # explicit raise (v5e default is 16 MiB)
        block_budget = 4 * 1024 * 1024
    else:                                     # v7x: 64 MiB physical per TC
        vmem_limit = 32 * 1024 * 1024
        block_budget = 2 * 1024 * 1024
    # Fused path keeps ~4 live copies of the sample slab (2 in + 2 out buffers)
    # plus tiny weight blocks -> gate the slab on (limit - headroom) / 4.
    fused_slab_budget = (vmem_limit - 2 * 1024 * 1024) // 4
    return vmem_limit, block_budget, fused_slab_budget


def _pick_s_tile(S, C, itemsize, block_budget):
    """Largest lane-dense (multiple-of-128) S tile whose block fits the budget."""
    s_pad = ((S + 127) // 128) * 128
    ts = (block_budget // (C * itemsize)) // 128 * 128
    ts = min(ts, s_pad)
    if ts < 128:
        # TODO(synk): extremely large C would also need channel tiling; fall
        # back to the minimum lane-dense tile and let vmem_limit absorb it.
        ts = 128
    return ts


def _spec(block_shape, index_map, buffers=None):
    """BlockSpec with optional deeper pipelining (guarded for older JAX)."""
    if buffers is not None and buffers != 2 and hasattr(pl, "Buffered"):
        try:
            return pl.BlockSpec(block_shape, index_map,
                                pipeline_mode=pl.Buffered(buffers))
        except TypeError:
            pass
    return pl.BlockSpec(block_shape, index_map)


# ---------------------------------------------------------------------------
# Kernels
# ---------------------------------------------------------------------------

def _fused_kernel(x_ref, wdt_ref, bd_ref, wu_ref, bu_ref, o_ref, *, inv_s):
    """Single-pass SE for one sample resident in VMEM.

    x_ref  : (C, S)  input dtype
    wdt_ref: (C, Ci) f32  (w_down transposed)
    bd_ref : (1, Ci) f32
    wu_ref : (C, Ci) f32
    bu_ref : (C, 1)  f32
    o_ref  : (C, S)  input dtype
    """
    # Global average pool (f32 accumulation).
    pooled = jnp.sum(x_ref[...].astype(jnp.float32), axis=-1, keepdims=True) * inv_s  # (C,1)
    # down (1x1x1 conv == FC) + ReLU, done with VPU broadcasts/reductions
    # (avoids tiny misaligned MXU matmuls).
    hidden = jnp.sum(wdt_ref[...] * pooled, axis=0, keepdims=True) + bd_ref[...]      # (1,Ci)
    hidden = jnp.maximum(hidden, 0.0)
    # up (1x1x1 conv == FC).  NOTE: no sigmoid -- the PyTorch forward multiplies
    # by the raw excitation.
    scale = jnp.sum(wu_ref[...] * hidden, axis=1, keepdims=True) + bu_ref[...]        # (C,1)
    # Scale; x is re-read from the VMEM-resident block (cheap), product cast back.
    o_ref[...] = (x_ref[...].astype(jnp.float32) * scale).astype(o_ref.dtype)


def _pool_kernel(x_ref, sum_ref, *, ts, S, need_mask):
    """Streaming pass 1: accumulate per-channel sums over S tiles.

    x_ref  : (C, ts) one S tile (input dtype)
    sum_ref: (C, 1)  f32 partial sum, resident across the last grid axis
    """
    @pl.when(pl.program_id(2) == 0)
    def _():
        sum_ref[...] = jnp.zeros_like(sum_ref)

    x = x_ref[...].astype(jnp.float32)
    if need_mask:
        # Tail tile: zero out lanes past the logical S (block padding is garbage).
        tile = pl.program_id(1) * pl.num_programs(2) + pl.program_id(2)
        col = lax.broadcasted_iota(jnp.int32, x.shape, 1)
        x = jnp.where(tile * ts + col < S, x, 0.0)
    sum_ref[...] += jnp.sum(x, axis=-1, keepdims=True)


def _scale_kernel(x_ref, s_ref, o_ref):
    """Streaming pass 2: out = x * scale (scale kept in f32, product cast back).

    x_ref: (C, ts) input dtype
    s_ref: (C, 1)  f32
    o_ref: (C, ts) input dtype -- lane-dense stores
    """
    o_ref[...] = (x_ref[...].astype(jnp.float32) * s_ref[...]).astype(o_ref.dtype)


# ---------------------------------------------------------------------------
# Paths
# ---------------------------------------------------------------------------

def _se_fused(x_flat, w_down, b_down, w_up, b_up, vmem_limit):
    N, C, S = x_flat.shape
    Ci = w_down.shape[0]
    wdt = w_down.astype(jnp.float32).T            # (C, Ci)
    bd = b_down.astype(jnp.float32).reshape(1, Ci)
    wu = w_up.astype(jnp.float32)                 # (C, Ci)
    bu = b_up.astype(jnp.float32).reshape(C, 1)

    kernel = functools.partial(_fused_kernel, inv_s=float(1.0 / S))
    return pl.pallas_call(
        kernel,
        out_shape=jax.ShapeDtypeStruct((N, C, S), x_flat.dtype),
        grid_spec=pltpu.PrefetchScalarGridSpec(
            num_scalar_prefetch=0,
            grid=(N,),
            in_specs=[
                pl.BlockSpec((None, C, S), lambda n: (n, 0, 0)),
                pl.BlockSpec((C, Ci), lambda n: (0, 0)),
                pl.BlockSpec((1, Ci), lambda n: (0, 0)),
                pl.BlockSpec((C, Ci), lambda n: (0, 0)),
                pl.BlockSpec((C, 1), lambda n: (0, 0)),
            ],
            out_specs=pl.BlockSpec((None, C, S), lambda n: (n, 0, 0)),
        ),
        compiler_params=pltpu.CompilerParams(
            dimension_semantics=("parallel",),
            vmem_limit_bytes=vmem_limit),
    )(x_flat, wdt, bd, wu, bu)


def _se_streaming(x_flat, w_down, b_down, w_up, b_up, block_budget, vmem_limit):
    N, C, S = x_flat.shape
    itemsize = x_flat.dtype.itemsize
    ts = _pick_s_tile(S, C, itemsize, block_budget)
    num_s = -(-S // ts)                      # cdiv
    need_mask = (S % ts) != 0

    # 2-way "parallel" split of the S reduction so both v7x TensorCores have
    # work when N is small/odd; partials are summed in the JAX FC step below.
    split = 2 if (N % 2 == 1) and (num_s % 2 == 0) and (num_s >= 2) else 1
    ns_per_split = num_s // split

    # ---- Pass 1: global average pool (streamed over S tiles) --------------
    pool_kernel = functools.partial(_pool_kernel, ts=ts, S=S, need_mask=need_mask)
    sums = pl.pallas_call(
        pool_kernel,
        out_shape=jax.ShapeDtypeStruct((N, split, C, 1), jnp.float32),
        grid_spec=pltpu.PrefetchScalarGridSpec(
            num_scalar_prefetch=0,
            grid=(N, split, ns_per_split),             # reduction axis last
            in_specs=[
                pl.BlockSpec((None, C, ts),
                             lambda n, p, s: (n, 0, p * ns_per_split + s)),
            ],
            out_specs=pl.BlockSpec((None, None, C, 1),
                                   lambda n, p, s: (n, p, 0, 0)),
        ),
        compiler_params=pltpu.CompilerParams(
            dimension_semantics=("parallel", "parallel", "arbitrary"),
            vmem_limit_bytes=vmem_limit),
    )(x_flat)

    # ---- Tiny FCs (1x1x1 convs) on the pooled vector, in plain JAX --------
    pooled = jnp.sum(sums, axis=1)[:, :, 0] * jnp.float32(1.0 / S)         # (N, C)
    hidden = jnp.maximum(pooled @ w_down.astype(jnp.float32).T
                         + b_down.astype(jnp.float32), 0.0)                # (N, Ci)
    scale = hidden @ w_up.astype(jnp.float32).T + b_up.astype(jnp.float32)  # (N, C)
    scale = scale.reshape(N, C, 1)           # stays f32; product is cast in-kernel

    # ---- Pass 2: streaming scale (out = x * scale) -------------------------
    # TODO(synk): if the caller can donate x, add input_output_aliases={0: 0}
    # here to overwrite x in place and halve the HBM footprint.
    out = pl.pallas_call(
        _scale_kernel,
        out_shape=jax.ShapeDtypeStruct((N, C, S), x_flat.dtype),
        grid_spec=pltpu.PrefetchScalarGridSpec(
            num_scalar_prefetch=0,
            grid=(N, num_s),
            in_specs=[
                _spec((None, C, ts), lambda n, s: (n, 0, s), buffers=3),
                pl.BlockSpec((None, C, 1), lambda n, s: (n, 0, 0)),
            ],
            out_specs=pl.BlockSpec((None, C, ts), lambda n, s: (n, 0, s)),
        ),
        compiler_params=pltpu.CompilerParams(
            dimension_semantics=("parallel", "parallel"),
            vmem_limit_bytes=vmem_limit),
    )(x_flat, scale)
    return out


def se_block(x, w_down, b_down, w_up, b_up, *,
             force_streaming=False, max_block_bytes=None):
    """
    x      : (N, C, D, H, W)
    w_down : (Ci, C)   (PyTorch Conv3d weight (Ci, C, 1, 1, 1) squeezed)
    b_down : (Ci,)
    w_up   : (C, Ci)
    b_up   : (C,)
    """
    N, C, D, H, W = x.shape
    S = D * H * W
    x_flat = x.reshape(N, C, S)

    vmem_limit, block_budget, fused_budget = _budgets()
    if max_block_bytes is not None:
        block_budget = max_block_bytes

    slab_bytes = C * S * x.dtype.itemsize
    if (not force_streaming) and slab_bytes <= fused_budget:
        out_flat = _se_fused(x_flat, w_down, b_down, w_up, b_up, vmem_limit)
    else:
        out_flat = _se_streaming(x_flat, w_down, b_down, w_up, b_up,
                                 block_budget, vmem_limit)
    return out_flat.reshape(N, C, D, H, W)


# ---------------------------------------------------------------------------
# Pure-JAX reference mirroring the PyTorch forward
# ---------------------------------------------------------------------------

def _reference(x, w_down, b_down, w_up, b_up):
    pooled = jnp.mean(x.astype(jnp.float32), axis=(2, 3, 4))   # (N, C)
    h = jnp.maximum(pooled @ w_down.T + b_down, 0.0)           # (N, Ci)
    s = h @ w_up.T + b_up                                      # (N, C)
    return (x.astype(jnp.float32) * s[:, :, None, None, None]).astype(x.dtype)


if __name__ == "__main__":
    key = jax.random.PRNGKey(0)
    N, C, Ci = 2, 16, 4
    D, H, W = 8, 16, 32          # S = 4096

    k1, k2, k3, k4, k5, k6 = jax.random.split(key, 6)
    x = jax.random.normal(k1, (N, C, D, H, W), dtype=jnp.float32)
    w_down = jax.random.normal(k2, (Ci, C), dtype=jnp.float32) * 0.1
    b_down = jax.random.normal(k3, (Ci,), dtype=jnp.float32) * 0.1
    w_up = jax.random.normal(k4, (C, Ci), dtype=jnp.float32) * 0.1
    b_up = jax.random.normal(k5, (C,), dtype=jnp.float32) * 0.1

    ref = _reference(x, w_down, b_down, w_up, b_up)

    # 1) Fused single-pass path (sample slab fits VMEM budget).
    out = se_block(x, w_down, b_down, w_up, b_up)
    jax.block_until_ready(out)
    assert out.shape == x.shape
    assert jnp.allclose(out, ref, atol=1e-4, rtol=1e-4), "fused path mismatch"

    # 2) Streaming two-pass path (forced), S divisible by the tile.
    out_s = se_block(x, w_down, b_down, w_up, b_up, force_streaming=True)
    jax.block_until_ready(out_s)
    assert jnp.allclose(out_s, ref, atol=1e-4, rtol=1e-4), "streaming path mismatch"

    # 3) Streaming, N=1 with a small block budget -> multiple S tiles and the
    #    2-way core-parallel pool split.
    out_1 = se_block(x[:1], w_down, b_down, w_up, b_up,
                     force_streaming=True, max_block_bytes=64 * 1024)
    jax.block_until_ready(out_1)
    assert jnp.allclose(out_1, ref[:1], atol=1e-4, rtol=1e-4), "split-pool mismatch"

    # 4) Ragged S (not a multiple of 128) -> cdiv grid + masked tail tiles.
    Dr, Hr, Wr = 5, 9, 7         # S = 315
    xr = jax.random.normal(k6, (1, C, Dr, Hr, Wr), dtype=jnp.float32)
    refr = _reference(xr, w_down, b_down, w_up, b_up)
    out_r = se_block(xr, w_down, b_down, w_up, b_up,
                     force_streaming=True, max_block_bytes=16 * 1024)
    jax.block_until_ready(out_r)
    assert jnp.allclose(out_r, refr, atol=1e-4, rtol=1e-4), "ragged-S streaming mismatch"
    out_rf = se_block(xr, w_down, b_down, w_up, b_up)          # fused, odd S
    jax.block_until_ready(out_rf)
    assert jnp.allclose(out_rf, refr, atol=1e-4, rtol=1e-4), "ragged-S fused mismatch"

    print("KERNEL_OK")
</pallas_src>

<mosaic_0001>
module attributes {stable_mosaic.version = 11 : i64} {
  func.func @_fused_kernel(%arg0: i32, %arg1: memref<1x16x4096xf32, #tpu.memory_space<vmem>>, %arg2: memref<16x4xf32, #tpu.memory_space<vmem>>, %arg3: memref<1x4xf32, #tpu.memory_space<vmem>>, %arg4: memref<16x4xf32, #tpu.memory_space<vmem>>, %arg5: memref<16x1xf32, #tpu.memory_space<vmem>>, %arg6: memref<1x16x4096xf32, #tpu.memory_space<vmem>>) attributes {dimension_semantics = [#tpu.dimension_semantics<parallel>], iteration_bounds = array<i64: 2>, scalar_prefetch = 0 : i64, scratch_operands = 0 : i64, tpu.core_type = #tpu.core_type<tc>, window_params = [{transform_indices = @transform_0, window_bounds = array<i64: 1, 16, 4096>}, {pipeline_mode = #tpu.pipeline_mode<synchronous>, transform_indices = @transform_1, window_bounds = array<i64: 16, 4>}, {pipeline_mode = #tpu.pipeline_mode<synchronous>, transform_indices = @transform_2, window_bounds = array<i64: 1, 4>}, {pipeline_mode = #tpu.pipeline_mode<synchronous>, transform_indices = @transform_3, window_bounds = array<i64: 16, 4>}, {pipeline_mode = #tpu.pipeline_mode<synchronous>, transform_indices = @transform_4, window_bounds = array<i64: 16, 1>}, {transform_indices = @transform_5, window_bounds = array<i64: 1, 16, 4096>}]} {
    %c0 = arith.constant 0 : index
    %c0_0 = arith.constant 0 : index
    %c0_1 = arith.constant 0 : index
    %0 = vector.load %arg1[%c0, %c0_0, %c0_1] : memref<1x16x4096xf32, #tpu.memory_space<vmem>>, vector<1x16x4096xf32>
    %1 = vector.shape_cast %0 : vector<1x16x4096xf32> to vector<16x4096xf32>
    %cst = arith.constant dense<0.000000e+00> : vector<16xf32>
    %2 = vector.multi_reduction <add>, %1, %cst [1] : vector<16x4096xf32> to vector<16xf32>
    %3 = vector.shape_cast %2 : vector<16xf32> to vector<16x1xf32>
    %cst_2 = arith.constant 2.44140625E-4 : f32
    %4 = vector.broadcast %cst_2 : f32 to vector<16x1xf32>
    %5 = arith.mulf %3, %4 : vector<16x1xf32>
    %c0_3 = arith.constant 0 : index
    %c0_4 = arith.constant 0 : index
    %6 = vector.load %arg2[%c0_3, %c0_4] : memref<16x4xf32, #tpu.memory_space<vmem>>, vector<16x4xf32>
    %7 = vector.broadcast %5 : vector<16x1xf32> to vector<16x4xf32>
    %8 = arith.mulf %6, %7 : vector<16x4xf32>
    %cst_5 = arith.constant dense<0.000000e+00> : vector<4xf32>
    %9 = vector.multi_reduction <add>, %8, %cst_5 [0] : vector<16x4xf32> to vector<4xf32>
    %10 = vector.shape_cast %9 : vector<4xf32> to vector<1x4xf32>
    %c0_6 = arith.constant 0 : index
    %c0_7 = arith.constant 0 : index
    %11 = vector.load %arg3[%c0_6, %c0_7] : memref<1x4xf32, #tpu.memory_space<vmem>>, vector<1x4xf32>
    %12 = arith.addf %10, %11 : vector<1x4xf32>
    %cst_8 = arith.constant 0.000000e+00 : f32
    %13 = vector.broadcast %cst_8 : f32 to vector<1x4xf32>
    %14 = arith.maximumf %12, %13 : vector<1x4xf32>
    %c0_9 = arith.constant 0 : index
    %c0_10 = arith.constant 0 : index
    %15 = vector.load %arg4[%c0_9, %c0_10] : memref<16x4xf32, #tpu.memory_space<vmem>>, vector<16x4xf32>
    %16 = vector.broadcast %14 : vector<1x4xf32> to vector<16x4xf32>
    %17 = arith.mulf %15, %16 : vector<16x4xf32>
    %cst_11 = arith.constant dense<0.000000e+00> : vector<16xf32>
    %18 = vector.multi_reduction <add>, %17, %cst_11 [1] : vector<16x4xf32> to vector<16xf32>
    %19 = vector.shape_cast %18 : vector<16xf32> to vector<16x1xf32>
    %c0_12 = arith.constant 0 : index
    %c0_13 = arith.constant 0 : index
    %20 = vector.load %arg5[%c0_12, %c0_13] : memref<16x1xf32, #tpu.memory_space<vmem>>, vector<16x1xf32>
    %21 = arith.addf %19, %20 : vector<16x1xf32>
    %c0_14 = arith.constant 0 : index
    %c0_15 = arith.constant 0 : index
    %c0_16 = arith.constant 0 : index
    %22 = vector.load %arg1[%c0_14, %c0_15, %c0_16] : memref<1x16x4096xf32, #tpu.memory_space<vmem>>, vector<1x16x4096xf32>
    %23 = vector.shape_cast %22 : vector<1x16x4096xf32> to vector<16x4096xf32>
    %24 = vector.broadcast %21 : vector<16x1xf32> to vector<16x4096xf32>
    %25 = arith.mulf %23, %24 : vector<16x4096xf32>
    %c0_17 = arith.constant 0 : index
    %c0_18 = arith.constant 0 : index
    %c0_19 = arith.constant 0 : index
    %26 = vector.load %arg6[%c0_17, %c0_18, %c0_19] : memref<1x16x4096xf32, #tpu.memory_space<vmem>>, vector<1x16x4096xf32>
    %27 = vector.shape_cast %26 : vector<1x16x4096xf32> to vector<16x4096xf32>
    %28 = vector.shape_cast %25 : vector<16x4096xf32> to vector<1x16x4096xf32>
    tpu.vector_store %arg6[%c0_17, %c0_18, %c0_19], %28 {strides = array<i32>} : memref<1x16x4096xf32, #tpu.memory_space<vmem>>, vector<1x16x4096xf32>,
    return
  }
  func.func @transform_0(%arg0: i32) -> (i32, i32, i32) {
    %c0_i32 = arith.constant 0 : i32
    %c0_i32_0 = arith.constant 0 : i32
    %c0_i32_1 = arith.constant 0 : i32
    return %arg0, %c0_i32, %c0_i32_0 : i32, i32, i32
  }
  func.func @transform_1(%arg0: i32) -> (i32, i32) {
    %c0_i32 = arith.constant 0 : i32
    %c0_i32_0 = arith.constant 0 : i32
    %c0_i32_1 = arith.constant 0 : i32
    return %c0_i32, %c0_i32_0 : i32, i32
  }
  func.func @transform_2(%arg0: i32) -> (i32, i32) {
    %c0_i32 = arith.constant 0 : i32
    %c0_i32_0 = arith.constant 0 : i32
    %c0_i32_1 = arith.constant 0 : i32
    return %c0_i32, %c0_i32_0 : i32, i32
  }
  func.func @transform_3(%arg0: i32) -> (i32, i32) {
    %c0_i32 = arith.constant 0 : i32
    %c0_i32_0 = arith.constant 0 : i32
    %c0_i32_1 = arith.constant 0 : i32
    return %c0_i32, %c0_i32_0 : i32, i32
  }
  func.func @transform_4(%arg0: i32) -> (i32, i32) {
    %c0_i32 = arith.constant 0 : i32
    %c0_i32_0 = arith.constant 0 : i32
    %c0_i32_1 = arith.constant 0 : i32
    return %c0_i32, %c0_i32_0 : i32, i32
  }
  func.func @transform_5(%arg0: i32) -> (i32, i32, i32) {
    %c0_i32 = arith.constant 0 : i32
    %c0_i32_0 = arith.constant 0 : i32
    %c0_i32_1 = arith.constant 0 : i32
    return %arg0, %c0_i32, %c0_i32_0 : i32, i32, i32
  }
}

</mosaic_0001>

<bundles_post_ra>
// kernel: tpu_custom_call.1
= control target key start
LH: loop header
LB: loop body
LE: loop exit
PB: predicated region body
PF: predicated region fallthrough
CT: control target
= control target key end

     0   :  { %10 = vsyncpa [#allocation3], 0  ;;  %s1441_s0 = inlined_call_operand.hbm [shape: f32[2,16,4096], index: 0, kind: input, shape index: {}]   ;;  %s1442_s1 = inlined_call_operand.vmem [shape: f32[16,4], index: 1, kind: input, shape index: {}]   ;;  %s1443_s2 = inlined_call_operand.vmem [shape: f32[1,4], index: 2, kind: input, shape index: {}]   ;;  %s1444_s3 = inlined_call_operand.vmem [shape: f32[16,4], index: 3, kind: input, shape index: {}]   ;;  %s1445_s4 = inlined_call_operand.vmem [shape: f32[16,1], index: 4, kind: input, shape index: {}]   ;;  %s1446_s5 = inlined_call_operand.hbm [shape: f32[2,16,4096], index: 5, kind: output, shape index: {}]  }
   0x1   :  { %12 = vsyncpa [#allocation3 + $0x1], 0 }
   0x2   :  { %13 = vsyncpa [#allocation4], 0 }
   0x3   :  { %15 = vsyncpa [#allocation4 + $0x1], 0  ;;  %s835_s18 = smov 0   ;;  %s837_s19 = smov 0  }
   0x4   :  { %s839_s20 = smov 0   ;;  %s841_s21 = smov 0  }
   0x5 LB: > { %s856_s22 = sadd.s32 4294967295, %s796_s21   ;;  %s635_s23 = sadd.s32 4294967294, %s796_s21   ;;  %s796_s21 = sphi %s841_s21, %s1515_s21   ;;  %s792_s20 = sphi %s839_s20, %s1514_s20   ;;  %s788_s19 = sphi %s837_s19, %s1513_s19   ;;  %s784_s18 = sphi %s835_s18, %s1512_s18  }
   0x6   : > { %s860_s24 = sadd.s32 1, %s796_s21   ;;  %s28_s25 = sadd.s32 1, %s792_s20 }
   0x7   : > { %s25_s26 = ssub.s32 %s796_s21, %s860_s24  ;;  %p35_p0 = scmp.ne.s32.totalorder %s792_s20, %s788_s19 }
   0x8   : > { %p26_p1 = scmp.eq.s32.totalorder %s25_s26, 0  ;;  %p36_p2 = scmp.eq.s32.totalorder %s796_s21, 0 }
   0x9   : > { %p41_p3 = scmp.ne.s32.totalorder %s788_s19, %s784_s18  ;;  %p42_p4 = scmp.eq.s32.totalorder %s856_s22, 0 }
   0xa   : > { %s872_s27 = scalar_select %p26_p1, %s792_s20, %s28_s25  }
   0xb   : > { %p874_p5 = por %p36_p2, %p35_p0  ;;  %p878_p6 = por %p42_p4, %p41_p3 }
   0xc   : > { %p149_p7 = scmp.eq.s32.totalorder %s856_s22, 1  ;;  %p155_p8 = scmp.eq.s32.totalorder %s635_s23, 1 }
   0xd   : > { %s1468_s29 = scalar_select %p878_p6, 1, 0 }
   0xe   : > { %p663_p10 = scmp.lt.s32.totalorder %s796_s21, 2  ;;  %p885_p11 = por %p149_p7, %p35_p0 }
   0xf   : > { %p889_p12 = por %p155_p8, %p41_p3  ;;  %s187_s7 = sand.u32 1, %s792_s20  }
  0x10   : > { %s1469_s30 = scalar_select %p885_p11, 1, 0 }
  0x11   : > { %s1470_s6 = scalar_select %p889_p12, 1, 0 }
  0x12   : > { %s649_s8 = sshll.u32 %s796_s21, 13  ;;  %s638_s9 = sshll.u32 %s187_s7, 9 }
  0x13   : > { %s898_s12 = scalar_lea.hbm %s1441_s0, %s649_s8  ;;  %s191_s13 = scalar_lea.vmem [#allocation2], %s638_s9 }
  0x14   : > { %s198_s14 = sshll.u32 %s191_s13, 4  ;;  %p902_p13 = pnand %p663_p10, %p874_p5  ;;  %s906_s14 = int_to_ptr.vmem [resolvable:$true] %s198_s14 }
  0x15   : > { %s908_s16 = scalar_lea.sflag [#allocation3], %s187_s7  ;;  %s704_s17 = scalar_lea.hbm %s898_s12, 8192 }
  0x16   : > { %p705_p0 = scmp.ne.s32.totalorder %s898_s12, %s704_s17  ;;  %p706_p1 = pneg %p902_p13 }
  0x17   : > { %s709_s26 = scalar_lea.hbm %s1441_s0, 16384  ;;  %p710_p4 = scmp.lt.s32.totalorder %s898_s12, %s1441_s0 }
  0x18   : > { %p707_p2 = pnand %p706_p1, %p705_p0  ;;  %p711_p5 = scmp.lt.s32.totalorder %s709_s26, %s704_s17 }
  0x1a   : > { %p708_p3 = pneg %p707_p2  ;;  %p712_p7 = por %p711_p5, %p710_p4 }
  0x1c   : > { %p713_p8 = pnand %p712_p7, %p708_p3 }
  0x1e   : > { %716 = shalt.err (!%p713_p8)
}
  0x1f   : > { %s717_s7 = scalar_lea.vmem %s906_s14, 8192  ;;  %s798_s9 = smov [#allocation2]  }
  0x20   : > { %p718_p10 = scmp.ne.s32.totalorder %s906_s14, %s717_s7  ;;  %s722_s10 = sshll.u32 %s798_s9, 4  ;;  %s723_s10 = int_to_ptr.vmem [resolvable:$false] %s722_s10 }
  0x21   : > { %s724_s11 = scalar_lea.vmem %s723_s10, 16384  ;;  %p725_p2 = scmp.lt.s32.totalorder %s906_s14, %s723_s10 }
  0x22   : > { %p720_p9 = pnand %p718_p10, %p706_p1  ;;  %p726_p12 = scmp.lt.s32.totalorder %s724_s11, %s717_s7 }
  0x24   : > { %p721_p0 = pneg %p720_p9  ;;  %p727_p11 = por %p726_p12, %p725_p2 }
  0x26   : > { %p728_p6 = pnand %p727_p11, %p721_p0 }
  0x28   : > { %731 = shalt.err (!%p728_p6)
}
  0x29   : > { %s799_s13 = smov 4096   ;;  %s800_s17 = smov 256  }
  0x2a   : > { %658 = dma.hbm_to_vmem [thread:$0]  (!%p902_p13), %s898_s12, 8192, %s906_s14, %s908_s16, %s799_s13, %s799_s13, %s800_s17  }
  0x2b   : > { %p641_p9 = scmp.ge.s32.totalorder %s796_s21, 1  ;;  %p206_p1 = scmp.lt.s32.totalorder %s796_s21, 3 }
  0x2d   : > { %p207_p3 = pnand %p641_p9, %p206_p1 }
  0x2f   : > { %210 = sbr.rel (%p207_p3) target bundleno = 602 (0x25a), region = 40 }
  0x34   : > { %s932_s23 = sand.u32 1, %s788_s19   ;;  %p1472_p6 = scmp.ne.s32.totalorder %s1468_s29, 0 }
  0x35   : > { %s642_s25 = sshll.u32 %s932_s23, 9  ;;  %s213_s26 = scalar_lea.sflag [#allocation3], %s932_s23 }
  0x36   : > { %s938_s28 = scalar_lea.vmem [#allocation2], %s642_s25 }
  0x37   : > { %775 = dma.done.wait (%p1472_p6), %s213_s26, 8192  }
  0x38   : > { %777 = vsyncadd (%p1472_p6), %s213_s26, 4294959104  ;;  %v945_v0 = vld [vmem:[%s938_s28] sm:$0xff]  ;;  %v948_v1 = vld [vmem:[%s938_s28 + $0x8] sm:$0xff]  ;;  %vm379_vm0 = vcmask 31744   ;;  %s1239_s29 = scalar_lea.vmem [#allocation5], %s642_s25  ;;  %s650_s25 = sshll.u32 %s856_s22, 13 }
  0x39   : > { %v951_v2 = vld [vmem:[%s938_s28 + $0x10] sm:$0xff]  ;;  %v307_v3 = vadd.f32 %v948_v1, %v945_v0  ;;  %v956_v4 = vld [vmem:[%s938_s28 + $0x18] sm:$0xff]  ;;  %v960_v6 = vld [vmem:[%s938_s28 + $0x20] sm:$0xff]  ;;  %s562_s12 = sshll.u32 %s1239_s29, 4  ;;  %s1376_s15 = scalar_lea.hbm %s1446_s5, %s650_s25  ;;  %s1378_s12 = int_to_ptr.vmem [resolvable:$true] %s562_s12 }
  0x3a   : > { %v964_v8 = vld [vmem:[%s938_s28 + $0x28] sm:$0xff]  ;;  %v968_v10 = vld [vmem:[%s938_s28 + $0x30] sm:$0xff]  ;;  %v972_v12 = vld [vmem:[%s938_s28 + $0x38] sm:$0xff]  ;;  %s549_s16 = scalar_lea.sflag [#allocation4], %s932_s23  ;;  %s732_s8 = scalar_lea.vmem %s1378_s12, 8192 }
  0x3b   : > { %v308_v5 = vadd.f32 %v307_v3, %v951_v2  ;;  %v975_v13 = vld [vmem:[%s938_s28 + $0x100] sm:$0xff]  ;;  %v979_v15 = vld [vmem:[%s938_s28 + $0x108] sm:$0xff]  ;;  %v982_v16 = vld [vmem:[%s938_s28 + $0x110] sm:$0xff]  ;;  %p733_p11 = scmp.ne.s32.totalorder %s1378_s12, %s732_s8  ;;  %p1509_p12 = scmp.ne.s32.totalorder %s1469_s30, 0 }
  0x3c   : > { %v985_v17 = vld [vmem:[%s938_s28 + $0x40] sm:$0xff]  ;;  %v340_v18 = vadd.f32 %v979_v15, %v975_v13  ;;  %v991_v20 = vld [vmem:[%s938_s28 + $0x118] sm:$0xff]  ;;  %v994_v21 = vld [vmem:[%s938_s28 + $0x48] sm:$0xff]  ;;  %s802_s7 = smov [#allocation5]  }
  0x3d   : > { %v309_v7 = vadd.f32 %v308_v5, %v956_v4  ;;  %v999_v24 = vld [vmem:[%s938_s28 + $0x120] sm:$0xff]  ;;  %v1002_v25 = vld [vmem:[%s938_s28 + $0x50] sm:$0xff]  ;;  %v1007_v28 = vld [vmem:[%s938_s28 + $0x128] sm:$0xff]  ;;  %p734_p13 = pnand %p733_p11, %p1509_p12  ;;  %s736_s9 = sshll.u32 %s802_s7, 4  ;;  %s737_s9 = int_to_ptr.vmem [resolvable:$false] %s736_s9 }
  0x3e   : > { %v341_v22 = vadd.f32 %v340_v18, %v982_v16  ;;  %v1010_v29 = vld [vmem:[%s938_s28 + $0x58] sm:$0xff]  ;;  %v1015_v32 = vld [vmem:[%s938_s28 + $0x130] sm:$0xff]  ;;  %v1018_v33 = vld [vmem:[%s938_s28 + $0x60] sm:$0xff]  ;;  %s738_s10 = scalar_lea.vmem %s737_s9, 16384  ;;  %p739_p5 = scmp.lt.s32.totalorder %s1378_s12, %s737_s9 }
  0x3f   : > { %v310_v9 = vadd.f32 %v309_v7, %v960_v6  ;;  %v1023_v36 = vld [vmem:[%s938_s28 + $0x138] sm:$0xff]  ;;  %v1026_v37 = vld [vmem:[%s938_s28 + $0x68] sm:$0xff]  ;;  %v1031_v40 = vld [vmem:[%s938_s28 + $0x140] sm:$0xff]  ;;  %p735_p4 = pneg %p734_p13  ;;  %p740_p7 = scmp.lt.s32.totalorder %s738_s10, %s732_s8 }
  0x40   : > { %v342_v26 = vadd.f32 %v341_v22, %v991_v20  ;;  %v1034_v41 = vld [vmem:[%s938_s28 + $0x70] sm:$0xff]  ;;  %v1039_v44 = vld [vmem:[%s938_s28 + $0x148] sm:$0xff]  ;;  %v1042_v45 = vld [vmem:[%s938_s28 + $0x78] sm:$0xff] }
  0x41   : > { %v311_v11 = vadd.f32 %v310_v9, %v964_v8  ;;  %v1047_v48 = vld [vmem:[%s938_s28 + $0x150] sm:$0xff]  ;;  %v1050_v49 = vld [vmem:[%s938_s28 + $0x80] sm:$0xff]  ;;  %v1055_v52 = vld [vmem:[%s938_s28 + $0x158] sm:$0xff]  ;;  %p741_p8 = por %p740_p7, %p739_p5 }
  0x42   : > { %v343_v30 = vadd.f32 %v342_v26, %v999_v24  ;;  %v1058_v53 = vld [vmem:[%s938_s28 + $0x88] sm:$0xff]  ;;  %v1063_v56 = vld [vmem:[%s938_s28 + $0x160] sm:$0xff]  ;;  %v1066_v57 = vld [vmem:[%s938_s28 + $0x90] sm:$0xff] }
  0x43   : > { %v312_v14 = vadd.f32 %v311_v11, %v968_v10  ;;  %v1071_v60 = vld [vmem:[%s938_s28 + $0x168] sm:$0xff]  ;;  %v1074_v61 = vld [vmem:[%s938_s28 + $0x98] sm:$0xff]  ;;  %v1079_v3 = vld [vmem:[%s938_s28 + $0x170] sm:$0xff]  ;;  %p742_p10 = pnand %p741_p8, %p735_p4 }
  0x44   : > { %v344_v34 = vadd.f32 %v343_v30, %v1007_v28  ;;  %1473 = vst [vmem:[#allocation8_spill] sm:$0xff] %v1079_v3  ;;  %v1082_v5 = vld [vmem:[%s938_s28 + $0xa0] sm:$0xff]  ;;  %v1087_v11 = vld [vmem:[%s938_s28 + $0x178] sm:$0xff]  ;;  %v1103_v30 = vld [vmem:[%s938_s28 + $0x188] sm:$0xff] }
  0x45   : > { %v313_v19 = vadd.f32 %v312_v14, %v972_v12  ;;  %1474 = vst [vmem:[#allocation9_spill] sm:$0xff] %v1087_v11  ;;  %v1090_v14 = vld [vmem:[%s938_s28 + $0xa8] sm:$0xff]  ;;  %v1095_v22 = vld [vmem:[%s938_s28 + $0x180] sm:$0xff]  ;;  %1476 = vst [vmem:[#allocation11_spill] sm:$0xff] %v1103_v30 }
  0x46   : > { %v345_v38 = vadd.f32 %v344_v34, %v1015_v32  ;;  %1475 = vst [vmem:[#allocation10_spill] sm:$0xff] %v1095_v22 }
  0x47   : > { %v314_v23 = vadd.f32 %v313_v19, %v985_v17 }
  0x48   : > { %v346_v42 = vadd.f32 %v345_v38, %v1023_v36  ;;  %v1111_v38 = vld [vmem:[%s938_s28 + $0x190] sm:$0xff] }
  0x49   : > { %v315_v27 = vadd.f32 %v314_v23, %v994_v21  ;;  %v1098_v23 = vld [vmem:[%s938_s28 + $0xb0] sm:$0xff]  ;;  %1477 = vst [vmem:[#allocation12_spill] sm:$0xff] %v1111_v38 }
  0x4a   : > { %v347_v46 = vadd.f32 %v346_v42, %v1031_v40 }
  0x4b   : > { %v316_v31 = vadd.f32 %v315_v27, %v1002_v25 }
  0x4c   : > { %v348_v50 = vadd.f32 %v347_v46, %v1039_v44  ;;  %v1119_v46 = vld [vmem:[%s938_s28 + $0x198] sm:$0xff] }
  0x4d   : > { %v317_v35 = vadd.f32 %v316_v31, %v1010_v29  ;;  %v1106_v31 = vld [vmem:[%s938_s28 + $0xb8] sm:$0xff]  ;;  %1478 = vst [vmem:[#allocation13_spill] sm:$0xff] %v1119_v46 }
  0x4e   : > { %v349_v54 = vadd.f32 %v348_v50, %v1047_v48 }
  0x4f   : > { %v318_v39 = vadd.f32 %v317_v35, %v1018_v33 }
  0x50   : > { %v350_v58 = vadd.f32 %v349_v54, %v1055_v52  ;;  %v1127_v54 = vld [vmem:[%s938_s28 + $0x1a0] sm:$0xff] }
  0x51   : > { %v319_v43 = vadd.f32 %v318_v39, %v1026_v37  ;;  %v1114_v39 = vld [vmem:[%s938_s28 + $0xc0] sm:$0xff]  ;;  %1479 = vst [vmem:[#allocation14_spill] sm:$0xff] %v1127_v54 }
  0x52   : > { %v351_v62 = vadd.f32 %v350_v58, %v1063_v56 }
  0x53   : > { %v320_v47 = vadd.f32 %v319_v43, %v1034_v41 }
  0x54   : > { %v352_v7 = vadd.f32 %v351_v62, %v1071_v60  ;;  %v1135_v62 = vld [vmem:[%s938_s28 + $0x1a8] sm:$0xff] }
  0x55   : > { %v321_v51 = vadd.f32 %v320_v47, %v1042_v45  ;;  %v1122_v47 = vld [vmem:[%s938_s28 + $0xc8] sm:$0xff]  ;;  %1480 = vst [vmem:[#allocation15_spill] sm:$0xff] %v1135_v62 }
  0x56   : > { %v353_v18 = vadd.f32 %v352_v7, %v1079_v3  ;;  %v389_v3 = vld [vmem:[%s1443_s2] sm:$0x1] }
  0x57   : > { %v322_v55 = vadd.f32 %v321_v51, %v1050_v49 }
  0x58   : > { %v354_v26 = vadd.f32 %v353_v18, %v1087_v11  ;;  %v1143_v18 = vld [vmem:[%s938_s28 + $0x1b0] sm:$0xff] }
  0x59   : > { %v323_v59 = vadd.f32 %v322_v55, %v1058_v53  ;;  %v1130_v55 = vld [vmem:[%s938_s28 + $0xd0] sm:$0xff]  ;;  %1481 = vst [vmem:[#allocation16_spill] sm:$0xff] %v1143_v18 }
  0x5a   : > { %v355_v34 = vadd.f32 %v354_v26, %v1095_v22 }
  0x5b   : > { %v324_v63 = vadd.f32 %v323_v59, %v1066_v57 }
  0x5c   : > { %v356_v42 = vadd.f32 %v355_v34, %v1103_v30  ;;  %v1151_v34 = vld [vmem:[%s938_s28 + $0x1b8] sm:$0xff] }
  0x5d   : > { %v325_v9 = vadd.f32 %v324_v63, %v1074_v61  ;;  %v1138_v63 = vld [vmem:[%s938_s28 + $0xd8] sm:$0xff]  ;;  %1482 = vst [vmem:[#allocation17_spill] sm:$0xff] %v1151_v34 }
  0x5e   : > { %v357_v50 = vadd.f32 %v356_v42, %v1111_v38  ;;  %v1188_v38 = vld [vmem:[%s938_s28 + $0x1e8] sm:$0xff] }
  0x5f   : > { %v326_v19 = vadd.f32 %v325_v9, %v1082_v5  ;;  %1488 = vst [vmem:[#allocation23_spill] sm:$0xff] %v1188_v38 }
  0x60   : > { %v358_v58 = vadd.f32 %v357_v50, %v1119_v46  ;;  %v1159_v50 = vld [vmem:[%s938_s28 + $0x1c0] sm:$0xff]  ;;  %v1180_v46 = vld [vmem:[%s938_s28 + $0x1d8] sm:$0xff] }
  0x61   : > { %v327_v27 = vadd.f32 %v326_v19, %v1090_v14  ;;  %v1146_v19 = vld [vmem:[%s938_s28 + $0xe0] sm:$0xff]  ;;  %1483 = vst [vmem:[#allocation18_spill] sm:$0xff] %v1159_v50  ;;  %1486 = vst [vmem:[#allocation21_spill] sm:$0xff] %v1180_v46 }
  0x62   : > { %v359_v7 = vadd.f32 %v358_v58, %v1127_v54 }
  0x63   : > { %v328_v35 = vadd.f32 %v327_v27, %v1098_v23 }
  0x64   : > { %v360_v26 = vadd.f32 %v359_v7, %v1135_v62  ;;  %v1167_v7 = vld [vmem:[%s938_s28 + $0x1c8] sm:$0xff] }
  0x65   : > { %v329_v43 = vadd.f32 %v328_v35, %v1106_v31  ;;  %v1154_v35 = vld [vmem:[%s938_s28 + $0xe8] sm:$0xff]  ;;  %1484 = vst [vmem:[#allocation19_spill] sm:$0xff] %v1167_v7 }
  0x66   : > { %v361_v42 = vadd.f32 %v360_v26, %v1143_v18 }
  0x67   : > { %v330_v51 = vadd.f32 %v329_v43, %v1114_v39 }
  0x68   : > { %v362_v58 = vadd.f32 %v361_v42, %v1151_v34 }
  0x69   : > { %v331_v59 = vadd.f32 %v330_v51, %v1122_v47  ;;  %v1162_v51 = vld [vmem:[%s938_s28 + $0xf0] sm:$0xff] }
  0x6a   : > { %v363_v26 = vadd.f32 %v362_v58, %v1159_v50 }
  0x6b   : > { %v332_v9 = vadd.f32 %v331_v59, %v1130_v55 }
  0x6c   : > { %v364_v62 = vadd.f32 %v363_v26, %v1167_v7  ;;  %v1196_v26 = vld [vmem:[%s938_s28 + $0x1f8] sm:$0xff] }
  0x6d   : > { %v333_v27 = vadd.f32 %v332_v9, %v1138_v63  ;;  %v1170_v9 = vld [vmem:[%s938_s28 + $0xf8] sm:$0xff]  ;;  %1490 = vst [vmem:[#allocation25_spill] sm:$0xff] %v1196_v26 }
  0x6f   : > { %v334_v43 = vadd.f32 %v333_v27, %v1146_v19  ;;  %v1175_v27 = vld [vmem:[%s938_s28 + $0x1d0] sm:$0xff] }
  0x70   : > { %1485 = vst [vmem:[#allocation20_spill] sm:$0xff] %v1175_v27  ;;  %v365_v42 = vadd.f32 %v364_v62, %v1175_v27  ;;  %v394_v27 = vlaneseq }
  0x71   : > { %v335_v59 = vadd.f32 %v334_v43, %v1154_v35  ;;  %v1184_v43 = vld [vmem:[%s938_s28 + $0x1e0] sm:$0xff] }
  0x72   : > { %1487 = vst [vmem:[#allocation22_spill] sm:$0xff] %v1184_v43  ;;  %v366_v34 = vadd.f32 %v365_v42, %v1180_v46  ;;  %v375_v42 = vld [vmem:[%s1442_s1] sm:$0xff]  ;;  %v395_v11 = vshrl.u32 %v394_v27, 7 }
  0x73   : > { %v336_v18 = vadd.f32 %v335_v59, %v1162_v51  ;;  %v1192_v59 = vld [vmem:[%s938_s28 + $0x1f0] sm:$0xff] }
  0x74   : > { %v367_v58 = vadd.f32 %v366_v34, %v1184_v43  ;;  %1489 = vst [vmem:[#allocation24_spill] sm:$0xff] %v1192_v59  ;;  %v376_v34 = vld [vmem:[%s1442_s1 + $0x8] sm:$0xff] }
  0x75   : > { %v337_v54 = vadd.f32 %v336_v18, %v1170_v9 }
  0x76   : > { %v368_v50 = vadd.f32 %v367_v58, %v1188_v38 }
  0x77   : > { %338 = vadd.xlane.f32.xlu0 %v337_v54 }
  0x78   : > { %v369_v18 = vadd.f32 %v368_v50, %v1192_v59 }
  0x7a   : > { %v370_v7 = vadd.f32 %v369_v18, %v1196_v26 }
  0x7c   : > { %371 = vadd.xlane.f32.xlu0 %v370_v7 }
 0x100   : > { %v339_v54 = vpop.xlane.xlu0 %338 }
 0x101   : > { %v373_v62 = vmul.f32 0.00024414063, %v339_v54 }
 0x103   : > { %v377_v46 = vmul.f32 %v375_v42, %v373_v62  ;;  %v396_v42 = vsub.s32 0, %v395_v11  ;;  %v406_v11 = vld [vmem:[%s1445_s4] sm:$0xff] }
 0x105   : > { %v372_v43 = vpop.xlane.xlu0 %371  ;;  %v380_v50 = vsel %vm379_vm0, %v377_v46, 0.0 }
 0x106   : > { %v374_v58 = vmul.f32 0.00024414063, %v372_v43 }
 0x108   : > { %v378_v38 = vmul.f32 %v376_v34, %v374_v58 }
 0x10a   : > { %v381_v18 = vsel %vm379_vm0, %v378_v38, 0.0  ;;  %v392_v38 = vld [vmem:[%s1444_s3] sm:$0xff] }
 0x10b   : > { %v382_v7 = vadd.f32 %v381_v18, %v380_v50  ;;  %v407_v18 = vld [vmem:[%s1445_s4 + $0x8] sm:$0xff] }
 0x10d   : > { %v383_v26 = vrot.slane %v382_v7, 4 }
 0x10f   : > { %v384_v54 = vadd.f32 %v383_v26, %v382_v7  ;;  %v393_v26 = vld [vmem:[%s1444_s3 + $0x8] sm:$0xff] }
 0x111   : > { %v385_v59 = vrot.slane %v384_v54, 2 }
 0x113   : > { %v386_v30 = vadd.f32 %v385_v59, %v384_v54 }
 0x115   : > { %v387_v22 = vrot.slane %v386_v30, 1 }
 0x117   : > { %v388_v62 = vadd.f32 %v387_v22, %v386_v30 }
 0x119   : > { %v390_v43 = vadd.f32 %v389_v3, %v388_v62  ;;  %v801_v3 = vmov 0  }
 0x11a   : > { %702 = vset.pattern.permute.xlu0 %v801_v3  ;;  %703 = vset.pattern.permute.xlu1 %v801_v3 }
 0x11b   : > { %v391_v34 = vmax.f32 %v390_v43, 0.0 }
 0x11d   : > { %v397_v46 = vrot.slane %v391_v34, %v396_v42 }
 0x11f   : > { %v398_v59 = vmul.f32 %v397_v46, %v392_v38  ;;  %v399_v58 = vmul.f32 %v397_v46, %v393_v26 }
 0x121   : > { %v400_v27 = vsel %vm379_vm0, %v398_v59, 0.0  ;;  %v403_v50 = vsel %vm379_vm0, %v399_v58, 0.0 }
 0x122   : > { %401 = vadd.xlane.f32.xlu1 %v400_v27 }
 0x126   : > { %404 = vadd.xlane.f32.xlu1 %v403_v50 }
 0x1ab   : > { %v402_v22 = vpop.xlane.xlu1 %401 }
 0x1ac   : > { %v408_v30 = vadd.f32 %v406_v11, %v402_v22  ;;  %v1496_v11 = vld [vmem:[#allocation13_spill] sm:$0xff] }
 0x1ae   : > { %412 = vperm.xlu0 %702, %v408_v30   ;;  %v1497_v30 = vld [vmem:[#allocation14_spill] sm:$0xff] }
 0x1af   : > { %v405_v7 = vpop.xlane.xlu1 %404 }
 0x1b0   : > { %v409_v54 = vadd.f32 %v407_v18, %v405_v7  ;;  %v1498_v7 = vld [vmem:[#allocation15_spill] sm:$0xff] }
 0x1b2   : > { %417 = vperm.xlu1 %703, %v409_v54  }
 0x229   : > { %v413_v62 = vpop.permute.xlu0 %412 }
 0x22a   : > { %v420_v43 = vmul.f32 %v413_v62, %v945_v0  ;;  %v421_v42 = vmul.f32 %v413_v62, %v948_v1  ;;  %v422_v34 = vmul.f32 %v413_v62, %v951_v2  ;;  %v423_v38 = vmul.f32 %v413_v62, %v956_v4 }
 0x22b   : > { %v424_v46 = vmul.f32 %v413_v62, %v960_v6  ;;  %v425_v26 = vmul.f32 %v413_v62, %v964_v8  ;;  %v426_v59 = vmul.f32 %v413_v62, %v968_v10  ;;  %v427_v27 = vmul.f32 %v413_v62, %v972_v12 }
 0x22c   : > { %v428_v58 = vmul.f32 %v413_v62, %v985_v17  ;;  %v429_v50 = vmul.f32 %v413_v62, %v994_v21  ;;  %v430_v0 = vmul.f32 %v413_v62, %v1002_v25  ;;  %v431_v1 = vmul.f32 %v413_v62, %v1010_v29  ;;  %484 = vst [vmem:[%s1239_s29] sm:$0xff] %v420_v43 }
 0x22d   : > { %485 = vst [vmem:[%s1239_s29 + $0x8] sm:$0xff] %v421_v42  ;;  %486 = vst [vmem:[%s1239_s29 + $0x10] sm:$0xff] %v422_v34  ;;  %v432_v2 = vmul.f32 %v413_v62, %v1018_v33  ;;  %v433_v4 = vmul.f32 %v413_v62, %v1026_v37  ;;  %v434_v6 = vmul.f32 %v413_v62, %v1034_v41  ;;  %v1269_v41 = vpop.permute.xlu1 %417  ;;  %v1500_v42 = vld [vmem:[#allocation17_spill] sm:$0xff] }
 0x22e   : > { %487 = vst [vmem:[%s1239_s29 + $0x18] sm:$0xff] %v423_v38  ;;  %v435_v8 = vmul.f32 %v413_v62, %v1042_v45  ;;  %488 = vst [vmem:[%s1239_s29 + $0x20] sm:$0xff] %v424_v46  ;;  %v436_v10 = vmul.f32 %v413_v62, %v1050_v49  ;;  %v437_v12 = vmul.f32 %v413_v62, %v1058_v53  ;;  %v1501_v38 = vld [vmem:[#allocation18_spill] sm:$0xff] }
 0x22f   : > { %489 = vst [vmem:[%s1239_s29 + $0x28] sm:$0xff] %v425_v26  ;;  %490 = vst [vmem:[%s1239_s29 + $0x30] sm:$0xff] %v426_v59  ;;  %v438_v17 = vmul.f32 %v413_v62, %v1066_v57  ;;  %v439_v21 = vmul.f32 %v413_v62, %v1074_v61  ;;  %v440_v25 = vmul.f32 %v413_v62, %v1082_v5  ;;  %v1502_v26 = vld [vmem:[#allocation19_spill] sm:$0xff] }
 0x230   : > { %491 = vst [vmem:[%s1239_s29 + $0x38] sm:$0xff] %v427_v27  ;;  %492 = vst [vmem:[%s1239_s29 + $0x40] sm:$0xff] %v428_v58  ;;  %v441_v29 = vmul.f32 %v413_v62, %v1090_v14  ;;  %v442_v33 = vmul.f32 %v413_v62, %v1098_v23  ;;  %v443_v37 = vmul.f32 %v413_v62, %v1106_v31  ;;  %v1503_v27 = vld [vmem:[#allocation20_spill] sm:$0xff] }
 0x231   : > { %493 = vst [vmem:[%s1239_s29 + $0x48] sm:$0xff] %v429_v50  ;;  %494 = vst [vmem:[%s1239_s29 + $0x50] sm:$0xff] %v430_v0  ;;  %v444_v45 = vmul.f32 %v413_v62, %v1114_v39  ;;  %v445_v49 = vmul.f32 %v413_v62, %v1122_v47  ;;  %v446_v53 = vmul.f32 %v413_v62, %v1130_v55  ;;  %v1504_v50 = vld [vmem:[#allocation21_spill] sm:$0xff] }
 0x232   : > { %495 = vst [vmem:[%s1239_s29 + $0x58] sm:$0xff] %v431_v1  ;;  %496 = vst [vmem:[%s1239_s29 + $0x60] sm:$0xff] %v432_v2  ;;  %v447_v57 = vmul.f32 %v413_v62, %v1138_v63  ;;  %v448_v61 = vmul.f32 %v413_v62, %v1146_v19  ;;  %v449_v5 = vmul.f32 %v413_v62, %v1154_v35  ;;  %v1494_v35 = vld [vmem:[#allocation11_spill] sm:$0xff]  ;;  %v1505_v1 = vld [vmem:[#allocation22_spill] sm:$0xff] }
 0x233   : > { %497 = vst [vmem:[%s1239_s29 + $0x68] sm:$0xff] %v433_v4  ;;  %498 = vst [vmem:[%s1239_s29 + $0x70] sm:$0xff] %v434_v6  ;;  %v450_v14 = vmul.f32 %v413_v62, %v1162_v51  ;;  %v451_v23 = vmul.f32 %v413_v62, %v1170_v9  ;;  %v452_v31 = vmul.f32 %v1269_v41, %v975_v13  ;;  %v1495_v9 = vld [vmem:[#allocation12_spill] sm:$0xff]  ;;  %v1506_v4 = vld [vmem:[#allocation23_spill] sm:$0xff] }
 0x234   : > { %499 = vst [vmem:[%s1239_s29 + $0x78] sm:$0xff] %v435_v8  ;;  %500 = vst [vmem:[%s1239_s29 + $0x80] sm:$0xff] %v436_v10  ;;  %v453_v39 = vmul.f32 %v1269_v41, %v979_v15  ;;  %v454_v47 = vmul.f32 %v1269_v41, %v982_v16  ;;  %v455_v55 = vmul.f32 %v1269_v41, %v991_v20  ;;  %v1499_v62 = vld [vmem:[#allocation16_spill] sm:$0xff] }
 0x235   : > { %501 = vst [vmem:[%s1239_s29 + $0x88] sm:$0xff] %v437_v12  ;;  %502 = vst [vmem:[%s1239_s29 + $0x90] sm:$0xff] %v438_v17  ;;  %v456_v13 = vmul.f32 %v1269_v41, %v999_v24  ;;  %v457_v15 = vmul.f32 %v1269_v41, %v1007_v28  ;;  %v458_v16 = vmul.f32 %v1269_v41, %v1015_v32  ;;  %v1507_v8 = vld [vmem:[#allocation24_spill] sm:$0xff]  ;;  %v1508_v12 = vld [vmem:[#allocation25_spill] sm:$0xff] }
 0x236   : > { %503 = vst [vmem:[%s1239_s29 + $0x98] sm:$0xff] %v439_v21  ;;  %504 = vst [vmem:[%s1239_s29 + $0xa0] sm:$0xff] %v440_v25  ;;  %v459_v20 = vmul.f32 %v1269_v41, %v1023_v36  ;;  %v460_v63 = vmul.f32 %v1269_v41, %v1031_v40  ;;  %v461_v24 = vmul.f32 %v1269_v41, %v1039_v44  ;;  %v1491_v40 = vld [vmem:[#allocation8_spill] sm:$0xff] }
 0x237   : > { %505 = vst [vmem:[%s1239_s29 + $0xa8] sm:$0xff] %v441_v29  ;;  %506 = vst [vmem:[%s1239_s29 + $0xb0] sm:$0xff] %v442_v33  ;;  %v462_v28 = vmul.f32 %v1269_v41, %v1047_v48  ;;  %v463_v19 = vmul.f32 %v1269_v41, %v1055_v52  ;;  %v464_v32 = vmul.f32 %v1269_v41, %v1063_v56  ;;  %v1492_v48 = vld [vmem:[#allocation9_spill] sm:$0xff]  ;;  %v1493_v56 = vld [vmem:[#allocation10_spill] sm:$0xff] }
 0x238   : > { %507 = vst [vmem:[%s1239_s29 + $0xb8] sm:$0xff] %v443_v37  ;;  %508 = vst [vmem:[%s1239_s29 + $0xc0] sm:$0xff] %v444_v45  ;;  %v465_v36 = vmul.f32 %v1269_v41, %v1071_v60  ;;  %v466_v44 = vmul.f32 %v1269_v41, %v1491_v40  ;;  %v467_v52 = vmul.f32 %v1269_v41, %v1492_v48 }
 0x239   : > { %509 = vst [vmem:[%s1239_s29 + $0xc8] sm:$0xff] %v445_v49  ;;  %510 = vst [vmem:[%s1239_s29 + $0xd0] sm:$0xff] %v446_v53  ;;  %v468_v60 = vmul.f32 %v1269_v41, %v1493_v56  ;;  %v469_v51 = vmul.f32 %v1269_v41, %v1494_v35  ;;  %v470_v3 = vmul.f32 %v1269_v41, %v1495_v9 }
 0x23a   : > { %511 = vst [vmem:[%s1239_s29 + $0xd8] sm:$0xff] %v447_v57  ;;  %512 = vst [vmem:[%s1239_s29 + $0xe0] sm:$0xff] %v448_v61  ;;  %v471_v22 = vmul.f32 %v1269_v41, %v1496_v11  ;;  %v472_v18 = vmul.f32 %v1269_v41, %v1497_v30  ;;  %v473_v54 = vmul.f32 %v1269_v41, %v1498_v7 }
 0x23b   : > { %513 = vst [vmem:[%s1239_s29 + $0xe8] sm:$0xff] %v449_v5  ;;  %514 = vst [vmem:[%s1239_s29 + $0xf0] sm:$0xff] %v450_v14  ;;  %v474_v43 = vmul.f32 %v1269_v41, %v1499_v62  ;;  %v475_v34 = vmul.f32 %v1269_v41, %v1500_v42  ;;  %v476_v46 = vmul.f32 %v1269_v41, %v1501_v38 }
 0x23c   : > { %515 = vst [vmem:[%s1239_s29 + $0xf8] sm:$0xff] %v451_v23  ;;  %516 = vst [vmem:[%s1239_s29 + $0x100] sm:$0xff] %v452_v31  ;;  %v477_v59 = vmul.f32 %v1269_v41, %v1502_v26  ;;  %v478_v58 = vmul.f32 %v1269_v41, %v1503_v27  ;;  %v479_v0 = vmul.f32 %v1269_v41, %v1504_v50 }
 0x23d   : > { %517 = vst [vmem:[%s1239_s29 + $0x108] sm:$0xff] %v453_v39  ;;  %518 = vst [vmem:[%s1239_s29 + $0x110] sm:$0xff] %v454_v47  ;;  %v480_v2 = vmul.f32 %v1269_v41, %v1505_v1  ;;  %v481_v6 = vmul.f32 %v1269_v41, %v1506_v4  ;;  %v482_v10 = vmul.f32 %v1269_v41, %v1507_v8 }
 0x23e   : > { %519 = vst [vmem:[%s1239_s29 + $0x118] sm:$0xff] %v455_v55  ;;  %520 = vst [vmem:[%s1239_s29 + $0x120] sm:$0xff] %v456_v13  ;;  %v483_v17 = vmul.f32 %v1269_v41, %v1508_v12 }
 0x23f   : > { %521 = vst [vmem:[%s1239_s29 + $0x128] sm:$0xff] %v457_v15  ;;  %522 = vst [vmem:[%s1239_s29 + $0x130] sm:$0xff] %v458_v16 }
 0x240   : > { %523 = vst [vmem:[%s1239_s29 + $0x138] sm:$0xff] %v459_v20  ;;  %524 = vst [vmem:[%s1239_s29 + $0x140] sm:$0xff] %v460_v63 }
 0x241   : > { %525 = vst [vmem:[%s1239_s29 + $0x148] sm:$0xff] %v461_v24  ;;  %526 = vst [vmem:[%s1239_s29 + $0x150] sm:$0xff] %v462_v28 }
 0x242   : > { %527 = vst [vmem:[%s1239_s29 + $0x158] sm:$0xff] %v463_v19  ;;  %528 = vst [vmem:[%s1239_s29 + $0x160] sm:$0xff] %v464_v32 }
 0x243   : > { %529 = vst [vmem:[%s1239_s29 + $0x168] sm:$0xff] %v465_v36  ;;  %530 = vst [vmem:[%s1239_s29 + $0x170] sm:$0xff] %v466_v44 }
 0x244   : > { %531 = vst [vmem:[%s1239_s29 + $0x178] sm:$0xff] %v467_v52  ;;  %532 = vst [vmem:[%s1239_s29 + $0x180] sm:$0xff] %v468_v60 }
 0x245   : > { %533 = vst [vmem:[%s1239_s29 + $0x188] sm:$0xff] %v469_v51  ;;  %534 = vst [vmem:[%s1239_s29 + $0x190] sm:$0xff] %v470_v3 }
 0x246   : > { %535 = vst [vmem:[%s1239_s29 + $0x198] sm:$0xff] %v471_v22  ;;  %536 = vst [vmem:[%s1239_s29 + $0x1a0] sm:$0xff] %v472_v18 }
 0x247   : > { %537 = vst [vmem:[%s1239_s29 + $0x1a8] sm:$0xff] %v473_v54  ;;  %538 = vst [vmem:[%s1239_s29 + $0x1b0] sm:$0xff] %v474_v43 }
 0x248   : > { %539 = vst [vmem:[%s1239_s29 + $0x1b8] sm:$0xff] %v475_v34  ;;  %540 = vst [vmem:[%s1239_s29 + $0x1c0] sm:$0xff] %v476_v46 }
 0x249   : > { %541 = vst [vmem:[%s1239_s29 + $0x1c8] sm:$0xff] %v477_v59  ;;  %542 = vst [vmem:[%s1239_s29 + $0x1d0] sm:$0xff] %v478_v58 }
 0x24a   : > { %543 = vst [vmem:[%s1239_s29 + $0x1d8] sm:$0xff] %v479_v0  ;;  %544 = vst [vmem:[%s1239_s29 + $0x1e0] sm:$0xff] %v480_v2 }
 0x24b   : > { %545 = vst [vmem:[%s1239_s29 + $0x1e8] sm:$0xff] %v481_v6  ;;  %546 = vst [vmem:[%s1239_s29 + $0x1f0] sm:$0xff] %v482_v10 }
 0x24c   : > { %547 = vst [vmem:[%s1239_s29 + $0x1f8] sm:$0xff] %v483_v17 }
 0x24d   : > { %745 = shalt.err (!%p742_p10)
}
 0x24e   : > { %s746_s11 = scalar_lea.hbm %s1376_s15, 8192  ;;  %s750_s26 = scalar_lea.hbm %s1446_s5, 16384 }
 0x24f   : > { %p747_p0 = scmp.ne.s32.totalorder %s1376_s15, %s746_s11  ;;  %p751_p1 = scmp.lt.s32.totalorder %s1376_s15, %s1446_s5 }
 0x250   : > { %p752_p3 = scmp.lt.s32.totalorder %s750_s26, %s746_s11 }
 0x251   : > { %p748_p2 = pnand %p747_p0, %p1509_p12 }
 0x252   : > { %p753_p6 = por %p752_p3, %p751_p1 }
 0x253   : > { %p749_p9 = pneg %p748_p2 }
 0x255   : > { %p754_p11 = pnand %p753_p6, %p749_p9 }
 0x257   : > { %757 = shalt.err (!%p754_p11)
}
 0x258   : > { %s803_s25 = smov 4096   ;;  %s804_s22 = smov 256  }
 0x259   : > { %653 = dma.vmem_to_hbm [thread:$0]  (%p1509_p12), %s1378_s12, 8192, %s1376_s15, %s549_s16, %s803_s25, %s803_s25, %s804_s22  }
 0x25a PF: > { %s577_s14 = sand.u32 1, %s784_s18   ;;  %p1510_p13 = scmp.ne.s32.totalorder %s1470_s6, 0 }
 0x25b   : > { %p1511_p4 = scmp.ge.s32.totalorder %s796_s21, 2  ;;  %s578_s8 = scalar_lea.sflag [#allocation4], %s577_s14 }
 0x25d   : > { %p660_p5 = pnand %p1511_p4, %p1510_p13 }
 0x25f   : > { %p661_p7 = pneg %p660_p5 }
 0x261   : > { %779 = dma.done.wait (%p661_p7), %s578_s8, 8192  }
 0x262   : > { %781 = vsyncadd (%p661_p7), %s578_s8, 4294959104  ;;  %p18_p8 = scmp.ge.s32.totalorder %s860_s24, 4   ;;  %s1512_s18 = smov %s788_s19 }
 0x263   : > { %s1513_s19 = smov %s792_s20  ;;  %s1514_s20 = smov %s872_s27 }
 0x264   : > { %s1515_s21 = smov %s860_s24  ;;  %20 = sbr.rel (!%p18_p8) target bundleno = 5 (0x5), region = 85 }
 0x269   :  { %583 = vsyncpa [#allocation3], 1 }
 0x26a   :  { %585 = vsyncpa [#allocation3 + $0x1], 1 }
 0x26b   :  { %586 = vsyncpa [#allocation4], 1 }
 0x26c   :  { %588 = vsyncpa [#allocation4 + $0x1], 1 }

</bundles_post_ra>
